<compile_context>
chip_gen: v6e
topology: v6e:2x2x1
jax: 0.10.0
libtpu: 0.0.40
codegen_flags: <defaults>
</compile_context>

<pallas_src>
import functools

import jax
import jax.numpy as jnp
from jax import lax
from jax.experimental import pallas as pl
from jax.experimental.pallas import tpu as pltpu


_UNROLL_CHUNKS = 8  # fully unroll the channel-chunk loop up to this many chunks


def _gwc_kernel_grouped(l_ref, r_ref, o_ref, *, cg: int, chunk: int, inv_cg: float):
    """l_ref, r_ref: (G, Cg, T) VMEM tiles with Cg % chunk == 0; o_ref: (G, T).

    Loads contiguous `chunk`-row (one packed sublane tile) slabs -> full-vreg
    vlds; the chunk-wide sublane reduce uses the otherwise-idle XLU slot, so
    the kernel stays purely HBM-DMA bound.  Accumulation is always f32.
    """
    n_chunks = cg // chunk

    def one_chunk(c0):
        lt = l_ref[:, pl.ds(c0, chunk), :].astype(jnp.float32)
        rt = r_ref[:, pl.ds(c0, chunk), :].astype(jnp.float32)
        return jnp.sum(lt * rt, axis=1)

    if n_chunks <= _UNROLL_CHUNKS:
        acc = one_chunk(0)
        for k in range(1, n_chunks):
            acc = acc + one_chunk(k * chunk)
    else:
        # Deep Cg: rolled loop bounds live ranges and code size; no throughput
        # loss since the kernel is memory bound.
        def body(k, acc):
            c0 = pl.multiple_of(k * chunk, chunk)
            return acc + one_chunk(c0)

        acc = lax.fori_loop(1, n_chunks, body, one_chunk(0))

    o_ref[...] = (acc * jnp.float32(inv_cg)).astype(o_ref.dtype)


def _gwc_kernel_flat(l_ref, r_ref, o_ref, *, g: int, cg: int, inv_cg: float):
    """Fallback when Cg is not a multiple of the sublane pack (e.g. Cg < 8).

    l_ref, r_ref: (C, T) dense 2-D tiles (no sublane padding); o_ref: (G, T).
    """
    prod = l_ref[...].astype(jnp.float32) * r_ref[...].astype(jnp.float32)
    acc = jnp.sum(prod.reshape(g, cg, prod.shape[-1]), axis=1)
    o_ref[...] = (acc * jnp.float32(inv_cg)).astype(o_ref.dtype)


def _vmem_budgets():
    """Returns (per-input block byte cap, scoped VMEM limit) per generation."""
    try:
        cap = int(pltpu.get_tpu_info().vmem_capacity_bytes)
    except Exception:
        cap = 64 << 20  # assume the most constrained generation (v7x per-TC)
    if cap >= 100 << 20:
        # v5e / v6e: 128 MiB physical VMEM.  6 MiB blocks -> ~26 MiB pipelined
        # footprint; raise the scoped limit (v5e defaults to only 16 MiB).
        return 6 << 20, 48 << 20
    # v7x: 64 MiB physical per TC -> keep total footprint <= ~24 MiB.
    return 4 << 20, 32 << 20


def _pick_lane_tile(hw: int, row_bytes: int, batch: int, block_byte_cap: int,
                    min_total_steps: int = 8) -> int:
    """Largest lane tile that (a) divides hw, (b) is a multiple of 128,
    (c) keeps one (C, t) input block under block_byte_cap, and (d) if possible
    leaves >= min_total_steps grid steps so both v7x TensorCores stay busy and
    the DMA prologue/epilogue is hidden."""
    cands = [t for t in range(128, hw + 1, 128) if hw % t == 0]
    assert cands, "hw must be a multiple of 128 (wrapper pads before calling)"
    fit = [t for t in cands if t * row_bytes <= block_byte_cap]
    if not fit:
        return cands[0]
    good = [t for t in fit if batch * (hw // t) >= min_total_steps]
    return max(good) if good else max(fit)


def gwc(left_feats, right_feats, num_groups, lane_tile=None):
    """Group-wise correlation: per-group channel mean of left*right.

    left_feats, right_feats: (B, C, H, W)  ->  (B, G, H, W).
    Inputs may be bf16 for ~2x HBM bandwidth; accumulation is always f32.
    """
    B, C, H, W = left_feats.shape
    assert right_feats.shape == (B, C, H, W)
    assert C % num_groups == 0, "C must be divisible by num_groups"
    G = num_groups
    Cg = C // G
    HW = H * W
    itemsize = jnp.dtype(left_feats.dtype).itemsize

    # Pad the flattened lane axis to a multiple of 128: avoids masked partial
    # vst stores and full-(C, HW) blocks that could blow scoped VMEM.
    pad = (-HW) % 128
    HWp = HW + pad
    l3 = left_feats.reshape(B, C, HW)
    r3 = right_feats.reshape(B, C, HW)
    if pad:
        l3 = jnp.pad(l3, ((0, 0), (0, 0), (0, pad)))
        r3 = jnp.pad(r3, ((0, 0), (0, 0), (0, pad)))

    # Channel-chunk size = one packed sublane tile (8 f32 rows / 16 bf16 rows).
    if itemsize == 2 and Cg % 16 == 0:
        chunk = 16
    elif Cg % 8 == 0:
        chunk = 8
    else:
        chunk = 0  # flat fallback path (no (Cg, T) sublane padding)

    block_cap, vmem_limit = _vmem_budgets()
    if chunk == 0:
        # Flat path materializes a (C, T) f32 product; keep blocks smaller.
        block_cap = min(block_cap, 2 << 20)

    if lane_tile is not None:
        t_hw = lane_tile
        assert HWp % t_hw == 0 and t_hw % 128 == 0, "bad lane_tile"
    else:
        t_hw = _pick_lane_tile(HWp, C * itemsize, B, block_cap)
    n_t = HWp // t_hw

    # Purely HBM-bandwidth-bound op; advise XLA's scheduler accordingly.
    cost = pl.CostEstimate(
        flops=2 * B * C * HWp,
        transcendentals=0,
        bytes_accessed=2 * B * C * HWp * itemsize + B * G * HWp * itemsize,
    )
    cparams = pltpu.CompilerParams(
        # Both axes independent -> shard across v7x's two TensorCores and give
        # many pipelined steps per core (harmless on v5e/v6e single core).
        dimension_semantics=("parallel", "parallel"),
        vmem_limit_bytes=vmem_limit,
    )

    if chunk:
        l4 = l3.reshape(B, G, Cg, HWp)
        r4 = r3.reshape(B, G, Cg, HWp)
        kernel = functools.partial(_gwc_kernel_grouped, cg=Cg, chunk=chunk,
                                   inv_cg=1.0 / Cg)
        in_specs = [
            pl.BlockSpec((pl.Squeezed(), G, Cg, t_hw), lambda b, t: (b, 0, 0, t)),
            pl.BlockSpec((pl.Squeezed(), G, Cg, t_hw), lambda b, t: (b, 0, 0, t)),
        ]
        operands = (l4, r4)
    else:
        kernel = functools.partial(_gwc_kernel_flat, g=G, cg=Cg, inv_cg=1.0 / Cg)
        in_specs = [
            pl.BlockSpec((pl.Squeezed(), C, t_hw), lambda b, t: (b, 0, t)),
            pl.BlockSpec((pl.Squeezed(), C, t_hw), lambda b, t: (b, 0, t)),
        ]
        operands = (l3, r3)

    out = pl.pallas_call(
        kernel,
        out_shape=jax.ShapeDtypeStruct((B, G, HWp), left_feats.dtype),
        grid=(B, n_t),
        in_specs=in_specs,
        out_specs=pl.BlockSpec((pl.Squeezed(), G, t_hw), lambda b, t: (b, 0, t)),
        compiler_params=cparams,
        cost_estimate=cost,
    )(*operands)

    if pad:
        out = out[:, :, :HW]
    return out.reshape(B, G, H, W)


def _reference(l, r, g):
    b, c, h, w = l.shape
    return jnp.mean((l * r).reshape(b, g, c // g, h, w), axis=2)


if __name__ == "__main__":
    key = jax.random.PRNGKey(0)
    k1, k2, k3, k4 = jax.random.split(key, 4)

    # Case 1: feature-map-like shape; Cg=8 -> grouped chunked path,
    # HW=4096 -> lane tile 1024, grid=(2, 4) (>= 8 steps for 2-TC sharding).
    B, C, H, W, G = 2, 64, 64, 64, 8
    left = jax.random.normal(k1, (B, C, H, W), dtype=jnp.float32)
    right = jax.random.normal(k2, (B, C, H, W), dtype=jnp.float32)
    cost1 = jax.block_until_ready(gwc(left, right, G))
    ref1 = _reference(left, right, G)
    assert cost1.shape == (B, G, H, W), cost1.shape
    assert jnp.allclose(cost1, ref1, atol=1e-4, rtol=1e-5), "mismatch (case 1)"

    # Case 2: tiny shape with shallow groups (Cg=4 -> flat 2-D fallback path).
    B2, C2, H2, W2, G2 = 2, 8, 16, 16, 2
    left2 = jax.random.normal(k3, (B2, C2, H2, W2), dtype=jnp.float32)
    right2 = jax.random.normal(k4, (B2, C2, H2, W2), dtype=jnp.float32)
    cost2 = jax.block_until_ready(gwc(left2, right2, G2))
    ref2 = _reference(left2, right2, G2)
    assert cost2.shape == (B2, G2, H2, W2), cost2.shape
    assert jnp.allclose(cost2, ref2, atol=1e-4, rtol=1e-5), "mismatch (case 2)"

    print("KERNEL_OK")
</pallas_src>

<mosaic_0001>
module attributes {stable_mosaic.version = 11 : i64} {
  func.func @_gwc_kernel_grouped(%arg0: i32, %arg1: i32, %arg2: memref<1x8x8x1024xf32, #tpu.memory_space<vmem>>, %arg3: memref<1x8x8x1024xf32, #tpu.memory_space<vmem>>, %arg4: memref<1x8x1024xf32, #tpu.memory_space<vmem>>) attributes {dimension_semantics = [#tpu.dimension_semantics<parallel>, #tpu.dimension_semantics<parallel>], iteration_bounds = array<i64: 2, 4>, scalar_prefetch = 0 : i64, scratch_operands = 0 : i64, tpu.core_type = #tpu.core_type<tc>, window_params = [{transform_indices = @transform_0, window_bounds = array<i64: 1, 8, 8, 1024>}, {transform_indices = @transform_1, window_bounds = array<i64: 1, 8, 8, 1024>}, {transform_indices = @transform_2, window_bounds = array<i64: 1, 8, 1024>}]} {
    %c0 = arith.constant 0 : index
    %c0_0 = arith.constant 0 : index
    %c0_1 = arith.constant 0 : index
    %c0_2 = arith.constant 0 : index
    %0 = vector.load %arg2[%c0, %c0_0, %c0_1, %c0_2] : memref<1x8x8x1024xf32, #tpu.memory_space<vmem>>, vector<1x8x8x1024xf32>
    %1 = vector.shape_cast %0 : vector<1x8x8x1024xf32> to vector<8x8x1024xf32>
    %c0_3 = arith.constant 0 : index
    %c0_4 = arith.constant 0 : index
    %c0_5 = arith.constant 0 : index
    %c0_6 = arith.constant 0 : index
    %2 = vector.load %arg3[%c0_3, %c0_4, %c0_5, %c0_6] : memref<1x8x8x1024xf32, #tpu.memory_space<vmem>>, vector<1x8x8x1024xf32>
    %3 = vector.shape_cast %2 : vector<1x8x8x1024xf32> to vector<8x8x1024xf32>
    %4 = arith.mulf %1, %3 : vector<8x8x1024xf32>
    %cst = arith.constant dense<0.000000e+00> : vector<8x1024xf32>
    %5 = vector.multi_reduction <add>, %4, %cst [1] : vector<8x8x1024xf32> to vector<8x1024xf32>
    %cst_7 = arith.constant 1.250000e-01 : f32
    %6 = vector.broadcast %cst_7 : f32 to vector<8x1024xf32>
    %7 = arith.mulf %5, %6 : vector<8x1024xf32>
    %c0_8 = arith.constant 0 : index
    %c0_9 = arith.constant 0 : index
    %c0_10 = arith.constant 0 : index
    %8 = vector.load %arg4[%c0_8, %c0_9, %c0_10] : memref<1x8x1024xf32, #tpu.memory_space<vmem>>, vector<1x8x1024xf32>
    %9 = vector.shape_cast %8 : vector<1x8x1024xf32> to vector<8x1024xf32>
    %10 = vector.shape_cast %7 : vector<8x1024xf32> to vector<1x8x1024xf32>
    tpu.vector_store %arg4[%c0_8, %c0_9, %c0_10], %10 {strides = array<i32>} : memref<1x8x1024xf32, #tpu.memory_space<vmem>>, vector<1x8x1024xf32>,
    return
  }
  func.func @transform_0(%arg0: i32, %arg1: i32) -> (i32, i32, i32, i32) {
    %c0_i32 = arith.constant 0 : i32
    %c0_i32_0 = arith.constant 0 : i32
    %c0_i32_1 = arith.constant 0 : i32
    return %arg0, %c0_i32, %c0_i32_0, %arg1 : i32, i32, i32, i32
  }
  func.func @transform_1(%arg0: i32, %arg1: i32) -> (i32, i32, i32, i32) {
    %c0_i32 = arith.constant 0 : i32
    %c0_i32_0 = arith.constant 0 : i32
    %c0_i32_1 = arith.constant 0 : i32
    return %arg0, %c0_i32, %c0_i32_0, %arg1 : i32, i32, i32, i32
  }
  func.func @transform_2(%arg0: i32, %arg1: i32) -> (i32, i32, i32) {
    %c0_i32 = arith.constant 0 : i32
    %c0_i32_0 = arith.constant 0 : i32
    return %arg0, %c0_i32, %arg1 : i32, i32, i32
  }
}

</mosaic_0001>

<bundles_post_ra>
// kernel: tpu_custom_call.1
= control target key start
LH: loop header
LB: loop body
LE: loop exit
PB: predicated region body
PF: predicated region fallthrough
CT: control target
= control target key end

     0   :  { %s2380_s0 = inlined_call_operand.hbm [shape: f32[2,8,8,4096], index: 0, kind: input, shape index: {}]   ;;  %s2381_s1 = inlined_call_operand.hbm [shape: f32[2,8,8,4096], index: 1, kind: input, shape index: {}]   ;;  %s2382_s2 = inlined_call_operand.hbm [shape: f32[2,8,4096], index: 2, kind: output, shape index: {}]  }
   0x1   :  { %2407 = sst [smem:[#allocation43_spill]] %s2380_s0 }
   0x2   :  { %7 = vsyncpa [#allocation3], 0 }
   0x3   :  { %9 = vsyncpa [#allocation3 + $0x1], 0 }
   0x4   :  { %10 = vsyncpa [#allocation6], 0 }
   0x5   :  { %12 = vsyncpa [#allocation6 + $0x1], 0 }
   0x6   :  { %13 = vsyncpa [#allocation4], 0 }
   0x7   :  { %15 = vsyncpa [#allocation4 + $0x1], 0  ;;  %s1427_s9 = smov 0   ;;  %s1429_s10 = smov 0  }
   0x8   :  { %s1431_s11 = smov 0   ;;  %s1433_s12 = smov 0  }
   0x9   :  { %s1435_s13 = smov 0   ;;  %s1437_s14 = smov 0  }
   0xa   :  { %s1439_s15 = smov 0   ;;  %s1441_s16 = smov 0  }
   0xb LB: > { %2408 = sst [smem:[#allocation11_spill]] %s1400_s15  ;;  %s1140_s17 = sadd.s32 4294967295, %s1404_s16   ;;  %s1404_s16 = sphi %s1441_s16, %s21_s16   ;;  %s1400_s15 = sphi %s1439_s15, %s2525_s15   ;;  %s1396_s14 = sphi %s1437_s14, %s2530_s14   ;;  %s1392_s13 = sphi %s1435_s13, %s2523_s13   ;;  %s1388_s12 = sphi %s1433_s12, %s2529_s12   ;;  %s1384_s11 = sphi %s1431_s11, %s2528_s11   ;;  %s1380_s10 = sphi %s1429_s10, %s2527_s10   ;;  %s1376_s9 = sphi %s1427_s9, %s2526_s9  }
   0xc   : > { %s1141_s18 = sadd.s32 4294967294, %s1404_s16   ;;  %s30_s19 = sadd.s32 1, %s1396_s14 }
   0xd   : > { %s33_s20 = sadd.s32 1, %s1400_s15  ;;  %p31_p0 = scmp.ge.s32.totalorder %s30_s19, 4 }
   0xe   : > { %s42_s21 = sadd.s32 1, %s1384_s11  ;;  %p49_p1 = scmp.ne.s32.totalorder %s1384_s11, %s1380_s10 }
   0xf   : > { %p50_p2 = scmp.eq.s32.totalorder %s1404_s16, 0  ;;  %s2532_s19 = smov (%p31_p0, %s30_s19), 0 }
  0x10   : > { %2409 = sst [smem:[#allocation12_spill]] %s2532_s19  ;;  %s2534_s20 = smov (!%p31_p0, %s33_s20), %s1400_s15 }
  0x11   : > { %s38_s22 = ssub.s32 %s1396_s14, %s2532_s19  ;;  %p1480_p3 = por %p50_p2, %p49_p1 }
  0x12   : > { %p35_p4 = scmp.ge.s32.totalorder %s2534_s20, 2  ;;  %p55_p5 = scmp.ne.s32.totalorder %s1380_s10, %s1376_s9 }
  0x13   : > { %p56_p6 = scmp.eq.s32.totalorder %s1140_s17, 0  ;;  %p109_p7 = scmp.eq.s32.totalorder %s1140_s17, 7 }
  0x14   : > { %s2536_s20 = smov (%p35_p4, %s2534_s20), 0  ;;  %p115_p10 = scmp.eq.s32.totalorder %s1141_s18, 7 }
  0x15   : > { %2411 = sst [smem:[#allocation13_spill]] %s2536_s20  ;;  %p1488_p8 = por %p56_p6, %p55_p5 }
  0x16   : > { %p1492_p9 = por %p109_p7, %p49_p1  ;;  %s37_s26 = ssub.s32 %s1400_s15, %s2536_s20 }
  0x17   : > { %s39_s27 = sor.u32 %s38_s22, %s37_s26  ;;  %p1498_p12 = por %p115_p10, %p55_p5 }
  0x18   : > { %p40_p11 = scmp.eq.s32.totalorder %s39_s27, 0  ;;  %p1179_p13 = scmp.lt.s32.totalorder %s1404_s16, 8 }
  0x19   : > { %s1504_s29 = sand.u32 1, %s1384_s11   ;;  %s1145_s4 = sshll.u32 %s1396_s14, 3 }
  0x1a   : > { %s1507_s30 = scalar_select %p40_p11, %s1384_s11, %s42_s21  }
  0x1b   : > { %s2383_s3 = sshll.u32 %s1504_s29, 9  ;;  %s1146_s5 = sshll.u32 %s1400_s15, 8 }
  0x1c   : > { %s139_s6 = scalar_lea.vmem [#allocation2], %s2383_s3  ;;  %s1514_s8 = sadd.s32 %s1146_s5, %s1145_s4 }
  0x1d   : > { %s148_s7 = sshll.u32 %s139_s6, 4  ;;  %s1147_s17 = sshll.u32 %s1514_s8, 7  ;;  %s149_s7 = int_to_ptr.vmem [resolvable:$true] %s148_s7 }
  0x1e   : > { %p1519_p0 = pnand %p1179_p13, %p1480_p3  ;;  %s2416_s0 = sld [smem:[#allocation43_spill]] }
  0x1f   : > { %p1152_p1 = scmp.ge.s32.totalorder %s1404_s16, 1  ;;  %s136_s27 = scalar_lea.sflag [#allocation3], %s1504_s29 }
  0x20   : > { %p1250_p2 = pneg %p1519_p0  ;;  %s1261_s4 = scalar_lea.vmem %s149_s7, 8192 }
  0x21   : > { %p1262_p4 = scmp.ne.s32.totalorder %s149_s7, %s1261_s4  ;;  %s1406_s23 = smov [#allocation2]  }
  0x22   : > { %s1266_s5 = sshll.u32 %s1406_s23, 4  ;;  %s1267_s5 = int_to_ptr.vmem [resolvable:$false] %s1266_s5 }
  0x23   : > { %p1264_p5 = pnand %p1262_p4, %p1250_p2  ;;  %s1268_s6 = scalar_lea.vmem %s1267_s5, 16384 }
  0x24   : > { %s147_s21 = scalar_lea.hbm %s2416_s0, %s1147_s17  ;;  %p1269_p3 = scmp.lt.s32.totalorder %s149_s7, %s1267_s5 }
  0x25   : > { %p1265_p6 = pneg %p1264_p5  ;;  %p1270_p7 = scmp.lt.s32.totalorder %s1268_s6, %s1261_s4 }
  0x27   : > { %p1271_p10 = por %p1270_p7, %p1269_p3 }
  0x29   : > { %p1272_p11 = pnand %p1271_p10, %p1265_p6 }
  0x2b   : > { %1275 = shalt.err (!%p1272_p11)
}
  0x2c   : > { %s1407_s8 = smov 4096   ;;  %s1408_s22 = smov 1024  }
  0x2d   : > { %s1409_s26 = smov 64   ;;  %p179_p13 = scmp.lt.s32.totalorder %s1404_s16, 9 }
  0x2e   : > { %1171 = dma.hbm_to_vmem [thread:$0]  (!%p1519_p0), %s147_s21, 8192, %s149_s7, %s136_s27, %s1407_s8, %s1408_s22, %s1409_s26  }
  0x2f   : > { %s170_s5 = scalar_lea.hbm %s2381_s1, %s1147_s17  ;;  %p1541_p4 = pnand %p1152_p1, %p179_p13 }
  0x30   : > { %s2418_s6 = sshll.u32 %s1504_s29, 9  ;;  %s159_s19 = scalar_lea.sflag [#allocation6], %s1504_s29 }
  0x31   : > { %s162_s0 = scalar_lea.vmem [#allocation5], %s2418_s6  ;;  %s1410_s7 = smov [#allocation5]  }
  0x32   : > { %s171_s20 = sshll.u32 %s162_s0, 4  ;;  %s1294_s21 = sshll.u32 %s1410_s7, 4  ;;  %s172_s20 = int_to_ptr.vmem [resolvable:$true] %s171_s20  ;;  %s1295_s21 = int_to_ptr.vmem [resolvable:$false] %s1294_s21 }
  0x33   : > { %s1289_s15 = scalar_lea.vmem %s172_s20, 8192  ;;  %s1296_s3 = scalar_lea.vmem %s1295_s21, 16384 }
  0x34   : > { %p1290_p5 = scmp.ne.s32.totalorder %s172_s20, %s1289_s15  ;;  %p1297_p7 = scmp.lt.s32.totalorder %s172_s20, %s1295_s21 }
  0x35   : > { %p1298_p1 = scmp.lt.s32.totalorder %s1296_s3, %s1289_s15 }
  0x36   : > { %p1292_p6 = pnand %p1290_p5, %p1250_p2 }
  0x37   : > { %p1299_p10 = por %p1298_p1, %p1297_p7 }
  0x38   : > { %p1293_p3 = pneg %p1292_p6 }
  0x3a   : > { %p1300_p11 = pnand %p1299_p10, %p1293_p3 }
  0x3c   : > { %1303 = shalt.err (!%p1300_p11)
}
  0x3d   : > { %1174 = dma.hbm_to_vmem [thread:$0]  (!%p1519_p0), %s170_s5, 8192, %s172_s20, %s159_s19, %s1407_s8, %s1408_s22, %s1409_s26  }
  0x3e   : > { %183 = sbr.rel (%p1541_p4) target bundleno = 255 (0xff), region = 28 }
  0x43   : > { %s1556_s0 = sand.u32 1, %s1380_s10  }
  0x44   : > { %s1153_s29 = sshll.u32 %s1556_s0, 9  ;;  %s186_s17 = scalar_lea.sflag [#allocation3], %s1556_s0 }
  0x45   : > { %s1560_s27 = scalar_lea.vmem [#allocation2], %s1153_s29 }
  0x46   : > { %1363 = dma.done.wait (%p1488_p8), %s186_s17, 8192  }
  0x47   : > { %1365 = vsyncadd (%p1488_p8), %s186_s17, 4294959104  ;;  %s195_s15 = scalar_lea.sflag [#allocation6], %s1556_s0  ;;  %s1567_s19 = scalar_lea.vmem [#allocation5], %s1153_s29 }
  0x48   : > { %1367 = dma.done.wait (%p1488_p8), %s195_s15, 8192  }
  0x49   : > { %1369 = vsyncadd (%p1488_p8), %s195_s15, 4294959104  ;;  %v227_v0 = vld [vmem:[%s1560_s27] sm:$0xff]  ;;  %v228_v1 = vld [vmem:[%s1560_s27 + $0x8] sm:$0xff]  ;;  %vm931_vm0 = vcmask 1041409   ;;  %vm933_vm1 = vcmask 1042434   ;;  %vm935_vm2 = vcmask 1043459  }
  0x4a   : > { %v229_v2 = vld [vmem:[%s1560_s27 + $0x10] sm:$0xff]  ;;  %v230_v3 = vld [vmem:[%s1560_s27 + $0x18] sm:$0xff]  ;;  %v231_v4 = vld [vmem:[%s1560_s27 + $0x20] sm:$0xff]  ;;  %s1155_s20 = sshll.u32 %s1556_s0, 6  ;;  %vm937_vm3 = vcmask 1044484   ;;  %vm939_vm4 = vcmask 1045509  }
  0x4b   : > { %v232_v5 = vld [vmem:[%s1560_s27 + $0x28] sm:$0xff]  ;;  %v233_v6 = vld [vmem:[%s1560_s27 + $0x30] sm:$0xff]  ;;  %v234_v7 = vld [vmem:[%s1560_s27 + $0x38] sm:$0xff]  ;;  %vm941_vm5 = vcmask 1046534   ;;  %vm943_vm6 = vcmask 1047559   ;;  %s1157_s24 = sshll.u32 %s1388_s12, 3 }
  0x4c   : > { %v235_v8 = vld [vmem:[%s1560_s27 + $0x40] sm:$0xff]  ;;  %v236_v9 = vld [vmem:[%s1560_s27 + $0x48] sm:$0xff]  ;;  %v237_v10 = vld [vmem:[%s1560_s27 + $0x50] sm:$0xff]  ;;  %s1158_s18 = sshll.u32 %s1392_s13, 5  ;;  %s2252_s8 = scalar_lea.vmem [#allocation7], %s1155_s20 }
  0x4d   : > { %v238_v11 = vld [vmem:[%s1560_s27 + $0x58] sm:$0xff]  ;;  %v239_v12 = vld [vmem:[%s1560_s27 + $0x60] sm:$0xff]  ;;  %v240_v13 = vld [vmem:[%s1560_s27 + $0x68] sm:$0xff]  ;;  %s1023_s12 = sadd.s32 %s1158_s18, %s1157_s24  ;;  %s1027_s22 = sshll.u32 %s2252_s8, 4  ;;  %s2324_s22 = int_to_ptr.vmem [resolvable:$true] %s1027_s22 }
  0x4e   : > { %v291_v14 = vld [vmem:[%s1567_s19] sm:$0xff]  ;;  %v292_v15 = vld [vmem:[%s1567_s19 + $0x8] sm:$0xff]  ;;  %v241_v16 = vld [vmem:[%s1560_s27 + $0x70] sm:$0xff]  ;;  %s1159_s13 = sshll.u32 %s1023_s12, 7  ;;  %s1011_s4 = scalar_lea.sflag [#allocation4], %s1556_s0 }
  0x4f   : > { %v242_v17 = vld [vmem:[%s1560_s27 + $0x78] sm:$0xff]  ;;  %v243_v18 = vld [vmem:[%s1560_s27 + $0x80] sm:$0xff]  ;;  %v293_v19 = vld [vmem:[%s1567_s19 + $0x10] sm:$0xff]  ;;  %v355_v22 = vmul.f32 %v291_v14, %v227_v0  ;;  %v356_v23 = vmul.f32 %v292_v15, %v228_v1  ;;  %s2322_s5 = scalar_lea.hbm %s2382_s2, %s1159_s13  ;;  %s1304_s6 = scalar_lea.vmem %s2324_s22, 1024 }
  0x50   : > { %v294_v20 = vld [vmem:[%s1567_s19 + $0x18] sm:$0xff]  ;;  %v295_v21 = vld [vmem:[%s1567_s19 + $0x20] sm:$0xff]  ;;  %v244_v24 = vld [vmem:[%s1560_s27 + $0x88] sm:$0xff]  ;;  %v1601_v30 = vmul.f32 %v293_v19, %v229_v2  ;;  %p1305_p8 = scmp.ne.s32.totalorder %s2324_s22, %s1304_s6  ;;  %s1411_s7 = smov [#allocation7]  }
  0x51   : > { %v245_v25 = vld [vmem:[%s1560_s27 + $0x90] sm:$0xff]  ;;  %v246_v26 = vld [vmem:[%s1560_s27 + $0x98] sm:$0xff]  ;;  %v296_v27 = vld [vmem:[%s1567_s19 + $0x28] sm:$0xff]  ;;  %v1603_v31 = vmul.f32 %v294_v20, %v230_v3  ;;  %v1605_v32 = vmul.f32 %v295_v21, %v231_v4  ;;  %v419_v42 = vrot.slane %v355_v22, 4  ;;  %v425_v52 = vrot.slane %v356_v23, 4  ;;  %s1308_s21 = sshll.u32 %s1411_s7, 4  ;;  %s1309_s21 = int_to_ptr.vmem [resolvable:$false] %s1308_s21 }
  0x52   : > { %v297_v28 = vld [vmem:[%s1567_s19 + $0x30] sm:$0xff]  ;;  %v298_v29 = vld [vmem:[%s1567_s19 + $0x38] sm:$0xff]  ;;  %v247_v33 = vld [vmem:[%s1560_s27 + $0xa0] sm:$0xff]  ;;  %v1613_v39 = vmul.f32 %v296_v27, %v232_v5  ;;  %p1306_p0 = pnand %p1305_p8, %p1492_p9  ;;  %s1310_s3 = scalar_lea.vmem %s1309_s21, 2048 }
  0x53   : > { %v248_v34 = vld [vmem:[%s1560_s27 + $0xa8] sm:$0xff]  ;;  %v249_v35 = vld [vmem:[%s1560_s27 + $0xb0] sm:$0xff]  ;;  %v299_v36 = vld [vmem:[%s1567_s19 + $0x40] sm:$0xff]  ;;  %v1615_v40 = vmul.f32 %v297_v28, %v233_v6  ;;  %v1617_v41 = vmul.f32 %v298_v29, %v234_v7  ;;  %v420_v62 = vadd.f32 %v419_v42, %v355_v22  ;;  %p1311_p13 = scmp.lt.s32.totalorder %s2324_s22, %s1309_s21  ;;  %p1312_p4 = scmp.lt.s32.totalorder %s1310_s3, %s1304_s6 }
  0x54   : > { %v300_v37 = vld [vmem:[%s1567_s19 + $0x48] sm:$0xff]  ;;  %v301_v38 = vld [vmem:[%s1567_s19 + $0x50] sm:$0xff]  ;;  %v250_v43 = vld [vmem:[%s1560_s27 + $0xb8] sm:$0xff]  ;;  %v1625_v49 = vmul.f32 %v299_v36, %v235_v8  ;;  %v426_v8 = vadd.f32 %v425_v52, %v356_v23  ;;  %p1307_p2 = pneg %p1306_p0 }
  0x55   : > { %v251_v44 = vld [vmem:[%s1560_s27 + $0xc0] sm:$0xff]  ;;  %v252_v45 = vld [vmem:[%s1560_s27 + $0xc8] sm:$0xff]  ;;  %v302_v46 = vld [vmem:[%s1567_s19 + $0x58] sm:$0xff]  ;;  %v1627_v50 = vmul.f32 %v300_v37, %v236_v9  ;;  %v1629_v51 = vmul.f32 %v301_v38, %v237_v10  ;;  %p1313_p5 = por %p1312_p4, %p1311_p13 }
  0x56   : > { %v303_v47 = vld [vmem:[%s1567_s19 + $0x60] sm:$0xff]  ;;  %v304_v48 = vld [vmem:[%s1567_s19 + $0x68] sm:$0xff]  ;;  %v253_v53 = vld [vmem:[%s1560_s27 + $0xd0] sm:$0xff]  ;;  %v1637_v59 = vmul.f32 %v302_v46, %v238_v11 }
  0x57   : > { %v254_v54 = vld [vmem:[%s1560_s27 + $0xd8] sm:$0xff]  ;;  %v255_v55 = vld [vmem:[%s1560_s27 + $0xe0] sm:$0xff]  ;;  %v305_v56 = vld [vmem:[%s1567_s19 + $0x70] sm:$0xff]  ;;  %v1639_v60 = vmul.f32 %v303_v47, %v239_v12  ;;  %v1641_v61 = vmul.f32 %v304_v48, %v240_v13  ;;  %p1314_p6 = pnand %p1313_p5, %p1307_p2 }
  0x58   : > { %v306_v57 = vld [vmem:[%s1567_s19 + $0x78] sm:$0xff]  ;;  %v307_v58 = vld [vmem:[%s1567_s19 + $0x80] sm:$0xff]  ;;  %v256_v63 = vld [vmem:[%s1560_s27 + $0xe8] sm:$0xff]  ;;  %v1649_v5 = vmul.f32 %v305_v56, %v241_v16 }
  0x59   : > { %v257_v0 = vld [vmem:[%s1560_s27 + $0xf0] sm:$0xff]  ;;  %v258_v1 = vld [vmem:[%s1560_s27 + $0xf8] sm:$0xff]  ;;  %v308_v2 = vld [vmem:[%s1567_s19 + $0x88] sm:$0xff]  ;;  %v1651_v6 = vmul.f32 %v306_v57, %v242_v17  ;;  %v1653_v7 = vmul.f32 %v307_v58, %v243_v18  ;;  %v421_v18 = vrot.slane %v420_v62, 2 }
  0x5a   : > { %v309_v3 = vld [vmem:[%s1567_s19 + $0x90] sm:$0xff]  ;;  %v310_v4 = vld [vmem:[%s1567_s19 + $0x98] sm:$0xff]  ;;  %v259_v9 = vld [vmem:[%s1560_s27 + $0x100] sm:$0xff]  ;;  %v1661_v15 = vmul.f32 %v308_v2, %v244_v24 }
  0x5b   : > { %v260_v10 = vld [vmem:[%s1560_s27 + $0x108] sm:$0xff]  ;;  %v261_v11 = vld [vmem:[%s1560_s27 + $0x110] sm:$0xff]  ;;  %v311_v12 = vld [vmem:[%s1567_s19 + $0xa0] sm:$0xff]  ;;  %v1663_v16 = vmul.f32 %v309_v3, %v245_v25  ;;  %v1665_v17 = vmul.f32 %v310_v4, %v246_v26  ;;  %v427_v26 = vrot.slane %v426_v8, 2 }
  0x5c   : > { %v312_v13 = vld [vmem:[%s1567_s19 + $0xa8] sm:$0xff]  ;;  %v313_v14 = vld [vmem:[%s1567_s19 + $0xb0] sm:$0xff]  ;;  %v262_v19 = vld [vmem:[%s1560_s27 + $0x118] sm:$0xff]  ;;  %v1673_v28 = vmul.f32 %v311_v12, %v247_v33 }
  0x5d   : > { %v263_v20 = vld [vmem:[%s1560_s27 + $0x120] sm:$0xff]  ;;  %v264_v21 = vld [vmem:[%s1560_s27 + $0x128] sm:$0xff]  ;;  %v314_v22 = vld [vmem:[%s1567_s19 + $0xb8] sm:$0xff]  ;;  %v1675_v24 = vmul.f32 %v312_v13, %v248_v34  ;;  %v1677_v25 = vmul.f32 %v313_v14, %v249_v35  ;;  %v422_v35 = vadd.f32 %v421_v18, %v420_v62 }
  0x5e   : > { %v315_v23 = vld [vmem:[%s1567_s19 + $0xc0] sm:$0xff]  ;;  %v316_v27 = vld [vmem:[%s1567_s19 + $0xc8] sm:$0xff]  ;;  %v265_v29 = vld [vmem:[%s1560_s27 + $0x130] sm:$0xff]  ;;  %v1685_v47 = vmul.f32 %v314_v22, %v250_v43 }
  0x5f   : > { %v266_v36 = vld [vmem:[%s1560_s27 + $0x138] sm:$0xff]  ;;  %v267_v37 = vld [vmem:[%s1560_s27 + $0x140] sm:$0xff]  ;;  %v317_v38 = vld [vmem:[%s1567_s19 + $0xd0] sm:$0xff]  ;;  %v1687_v33 = vmul.f32 %v315_v23, %v251_v44  ;;  %v1689_v34 = vmul.f32 %v316_v27, %v252_v45  ;;  %v428_v45 = vadd.f32 %v427_v26, %v426_v8 }
  0x60   : > { %v318_v42 = vld [vmem:[%s1567_s19 + $0xd8] sm:$0xff]  ;;  %v319_v46 = vld [vmem:[%s1567_s19 + $0xe0] sm:$0xff]  ;;  %v268_v48 = vld [vmem:[%s1560_s27 + $0x148] sm:$0xff]  ;;  %v1697_v3 = vmul.f32 %v317_v38, %v253_v53 }
  0x61   : > { %v269_v52 = vld [vmem:[%s1560_s27 + $0x150] sm:$0xff]  ;;  %v270_v56 = vld [vmem:[%s1560_s27 + $0x158] sm:$0xff]  ;;  %v320_v57 = vld [vmem:[%s1567_s19 + $0xe8] sm:$0xff]  ;;  %v1699_v43 = vmul.f32 %v318_v42, %v254_v54  ;;  %v1701_v44 = vmul.f32 %v319_v46, %v255_v55  ;;  %v423_v55 = vrot.slane %v422_v35, 1 }
  0x62   : > { %v321_v58 = vld [vmem:[%s1567_s19 + $0xf0] sm:$0xff]  ;;  %v322_v2 = vld [vmem:[%s1567_s19 + $0xf8] sm:$0xff]  ;;  %v271_v62 = vld [vmem:[%s1560_s27 + $0x160] sm:$0xff]  ;;  %v1709_v22 = vmul.f32 %v320_v57, %v256_v63 }
  0x63   : > { %2419 = vst [vmem:[#allocation14_spill] sm:$0xff] %v1701_v44  ;;  %v272_v4 = vld [vmem:[%s1560_s27 + $0x168] sm:$0xff]  ;;  %v273_v12 = vld [vmem:[%s1560_s27 + $0x170] sm:$0xff]  ;;  %v323_v13 = vld [vmem:[%s1567_s19 + $0x100] sm:$0xff]  ;;  %v1711_v53 = vmul.f32 %v321_v58, %v257_v0  ;;  %v1713_v54 = vmul.f32 %v322_v2, %v258_v1  ;;  %v429_v1 = vrot.slane %v428_v45, 1 }
  0x64   : > { %v324_v14 = vld [vmem:[%s1567_s19 + $0x108] sm:$0xff]  ;;  %v325_v18 = vld [vmem:[%s1567_s19 + $0x110] sm:$0xff]  ;;  %2420 = vst [vmem:[#allocation15_spill] sm:$0xff] %v1709_v22  ;;  %v274_v8 = vld [vmem:[%s1560_s27 + $0x178] sm:$0xff]  ;;  %v1721_v46 = vmul.f32 %v323_v13, %v259_v9 }
  0x65   : > { %2421 = vst [vmem:[#allocation16_spill] sm:$0xff] %v1711_v53  ;;  %2422 = vst [vmem:[#allocation17_spill] sm:$0xff] %v1713_v54  ;;  %v275_v23 = vld [vmem:[%s1560_s27 + $0x180] sm:$0xff]  ;;  %v276_v27 = vld [vmem:[%s1560_s27 + $0x188] sm:$0xff]  ;;  %v1723_v63 = vmul.f32 %v324_v14, %v260_v10  ;;  %v1725_v0 = vmul.f32 %v325_v18, %v261_v11  ;;  %v1739_v11 = vadd.f32 %v423_v55, %v422_v35 }
  0x66   : > { %v326_v26 = vld [vmem:[%s1567_s19 + $0x118] sm:$0xff]  ;;  %v327_v38 = vld [vmem:[%s1567_s19 + $0x120] sm:$0xff]  ;;  %v328_v42 = vld [vmem:[%s1567_s19 + $0x128] sm:$0xff]  ;;  %2423 = vst [vmem:[#allocation18_spill] sm:$0xff] %v1721_v46  ;;  %v1753_v35 = vadd.f32 %v429_v1, %v428_v45  ;;  %v431_v45 = vrot.slane %v1601_v30, 4 }
  0x67   : > { %2424 = vst [vmem:[#allocation19_spill] sm:$0xff] %v1723_v63  ;;  %2425 = vst [vmem:[#allocation20_spill] sm:$0xff] %v1725_v0  ;;  %v277_v57 = vld [vmem:[%s1560_s27 + $0x190] sm:$0xff]  ;;  %v278_v58 = vld [vmem:[%s1560_s27 + $0x198] sm:$0xff]  ;;  %v1733_v44 = vmul.f32 %v326_v26, %v262_v19  ;;  %v1735_v9 = vmul.f32 %v327_v38, %v263_v20  ;;  %v1737_v10 = vmul.f32 %v328_v42, %v264_v21 }
  0x68   : > { %v279_v2 = vld [vmem:[%s1560_s27 + $0x1a0] sm:$0xff]  ;;  %v329_v54 = vld [vmem:[%s1567_s19 + $0x130] sm:$0xff]  ;;  %v330_v53 = vld [vmem:[%s1567_s19 + $0x138] sm:$0xff]  ;;  %2427 = vst [vmem:[#allocation22_spill] sm:$0xff] %v1739_v11 }
  0x69   : > { %v331_v22 = vld [vmem:[%s1567_s19 + $0x140] sm:$0xff]  ;;  %2426 = vst [vmem:[#allocation21_spill] sm:$0xff] %v1737_v10  ;;  %v280_v13 = vld [vmem:[%s1560_s27 + $0x1a8] sm:$0xff]  ;;  %v281_v14 = vld [vmem:[%s1560_s27 + $0x1b0] sm:$0xff]  ;;  %v1747_v19 = vmul.f32 %v329_v54, %v265_v29  ;;  %v1749_v20 = vmul.f32 %v330_v53, %v266_v36 }
  0x6a   : > { %v282_v18 = vld [vmem:[%s1560_s27 + $0x1b8] sm:$0xff]  ;;  %v332_v0 = vld [vmem:[%s1567_s19 + $0x148] sm:$0xff]  ;;  %v333_v63 = vld [vmem:[%s1567_s19 + $0x150] sm:$0xff]  ;;  %v1751_v21 = vmul.f32 %v331_v22, %v267_v37  ;;  %2431 = vst [vmem:[#allocation26_spill] sm:$0xff] %v1753_v35 }
  0x6b   : > { %v334_v46 = vld [vmem:[%s1567_s19 + $0x158] sm:$0xff]  ;;  %2428 = vst [vmem:[#allocation23_spill] sm:$0xff] %v1747_v19  ;;  %2429 = vst [vmem:[#allocation24_spill] sm:$0xff] %v1749_v20  ;;  %v283_v55 = vld [vmem:[%s1560_s27 + $0x1c0] sm:$0xff]  ;;  %v1761_v29 = vmul.f32 %v332_v0, %v268_v48  ;;  %v1763_v36 = vmul.f32 %v333_v63, %v269_v52 }
  0x6c   : > { %2430 = vst [vmem:[#allocation25_spill] sm:$0xff] %v1751_v21  ;;  %v284_v26 = vld [vmem:[%s1560_s27 + $0x1c8] sm:$0xff]  ;;  %v285_v38 = vld [vmem:[%s1560_s27 + $0x1d0] sm:$0xff]  ;;  %v335_v42 = vld [vmem:[%s1567_s19 + $0x160] sm:$0xff]  ;;  %v1765_v37 = vmul.f32 %v334_v46, %v270_v56  ;;  %v437_v56 = vrot.slane %v1603_v31, 4 }
  0x6d   : > { %v336_v11 = vld [vmem:[%s1567_s19 + $0x168] sm:$0xff]  ;;  %v337_v10 = vld [vmem:[%s1567_s19 + $0x170] sm:$0xff]  ;;  %2432 = vst [vmem:[#allocation27_spill] sm:$0xff] %v1761_v29  ;;  %2433 = vst [vmem:[#allocation28_spill] sm:$0xff] %v1763_v36  ;;  %v1774_v48 = vmul.f32 %v335_v42, %v271_v62 }
  0x6e   : > { %2434 = vst [vmem:[#allocation29_spill] sm:$0xff] %v1765_v37  ;;  %v286_v22 = vld [vmem:[%s1560_s27 + $0x1d8] sm:$0xff]  ;;  %v287_v53 = vld [vmem:[%s1560_s27 + $0x1e0] sm:$0xff]  ;;  %v288_v54 = vld [vmem:[%s1560_s27 + $0x1e8] sm:$0xff]  ;;  %v1776_v0 = vmul.f32 %v336_v11, %v272_v4  ;;  %v1778_v52 = vmul.f32 %v337_v10, %v273_v12  ;;  %v432_v4 = vadd.f32 %v431_v45, %v1601_v30 }
  0x6f   : > { %v338_v1 = vld [vmem:[%s1567_s19 + $0x178] sm:$0xff]  ;;  %v339_v35 = vld [vmem:[%s1567_s19 + $0x180] sm:$0xff]  ;;  %v340_v21 = vld [vmem:[%s1567_s19 + $0x188] sm:$0xff] }
  0x70   : > { %2435 = vst [vmem:[#allocation30_spill] sm:$0xff] %v1776_v0  ;;  %2436 = vst [vmem:[#allocation31_spill] sm:$0xff] %v1778_v52  ;;  %v289_v46 = vld [vmem:[%s1560_s27 + $0x1f0] sm:$0xff]  ;;  %v290_v63 = vld [vmem:[%s1560_s27 + $0x1f8] sm:$0xff]  ;;  %v1786_v20 = vmul.f32 %v338_v1, %v274_v8  ;;  %v1788_v19 = vmul.f32 %v339_v35, %v275_v23  ;;  %v1790_v62 = vmul.f32 %v340_v21, %v276_v27  ;;  %v433_v1 = vrot.slane %v432_v4, 2 }
  0x71   : > { %v341_v37 = vld [vmem:[%s1567_s19 + $0x190] sm:$0xff]  ;;  %v342_v36 = vld [vmem:[%s1567_s19 + $0x198] sm:$0xff]  ;;  %v343_v29 = vld [vmem:[%s1567_s19 + $0x1a0] sm:$0xff]  ;;  %v438_v8 = vadd.f32 %v437_v56, %v1603_v31 }
  0x72   : > { %v344_v12 = vld [vmem:[%s1567_s19 + $0x1a8] sm:$0xff]  ;;  %v345_v10 = vld [vmem:[%s1567_s19 + $0x1b0] sm:$0xff]  ;;  %v346_v11 = vld [vmem:[%s1567_s19 + $0x1b8] sm:$0xff]  ;;  %v1796_v42 = vmul.f32 %v341_v37, %v277_v57  ;;  %v1798_v52 = vmul.f32 %v342_v36, %v278_v58  ;;  %v1800_v0 = vmul.f32 %v343_v29, %v279_v2 }
  0x73   : > { %v347_v23 = vld [vmem:[%s1567_s19 + $0x1c0] sm:$0xff]  ;;  %v348_v27 = vld [vmem:[%s1567_s19 + $0x1c8] sm:$0xff]  ;;  %v349_v21 = vld [vmem:[%s1567_s19 + $0x1d0] sm:$0xff]  ;;  %v1806_v35 = vmul.f32 %v344_v12, %v280_v13  ;;  %v1808_v30 = vmul.f32 %v345_v10, %v281_v14  ;;  %v1810_v45 = vmul.f32 %v346_v11, %v282_v18  ;;  %v439_v31 = vrot.slane %v438_v8, 2 }
  0x74   : > { %2437 = vst [vmem:[#allocation32_spill] sm:$0xff] %v1798_v52  ;;  %2438 = vst [vmem:[#allocation33_spill] sm:$0xff] %v1800_v0  ;;  %v350_v57 = vld [vmem:[%s1567_s19 + $0x1d8] sm:$0xff]  ;;  %v351_v37 = vld [vmem:[%s1567_s19 + $0x1e0] sm:$0xff]  ;;  %v1815_v36 = vmul.f32 %v347_v23, %v283_v55  ;;  %v1817_v2 = vmul.f32 %v348_v27, %v284_v26  ;;  %v1819_v29 = vmul.f32 %v349_v21, %v285_v38  ;;  %v443_v26 = vrot.slane %v1605_v32, 4 }
  0x75   : > { %v352_v58 = vld [vmem:[%s1567_s19 + $0x1e8] sm:$0xff]  ;;  %v353_v56 = vld [vmem:[%s1567_s19 + $0x1f0] sm:$0xff]  ;;  %v354_v0 = vld [vmem:[%s1567_s19 + $0x1f8] sm:$0xff]  ;;  %v1823_v52 = vmul.f32 %v350_v57, %v286_v22  ;;  %v1825_v13 = vmul.f32 %v351_v37, %v287_v53  ;;  %v434_v18 = vadd.f32 %v433_v1, %v432_v4  ;;  %v440_v55 = vadd.f32 %v439_v31, %v438_v8 }
  0x76   : > { %v1827_v14 = vmul.f32 %v352_v58, %v288_v54  ;;  %v1829_v12 = vmul.f32 %v353_v56, %v289_v46  ;;  %v1831_v10 = vmul.f32 %v354_v0, %v290_v63  ;;  %v449_v38 = vrot.slane %v1613_v39, 4 }
  0x77   : > { %v435_v11 = vrot.slane %v434_v18, 1  ;;  %v455_v23 = vrot.slane %v1615_v40, 4  ;;  %v461_v22 = vrot.slane %v1617_v41, 4  ;;  %v441_v27 = vrot.slane %v440_v55, 1 }
  0x78   : > { %2439 = vst [vmem:[#allocation34_spill] sm:$0xff] %v1829_v12  ;;  %2440 = vst [vmem:[#allocation35_spill] sm:$0xff] %v1831_v10  ;;  %v444_v53 = vadd.f32 %v443_v26, %v1605_v32  ;;  %v467_v54 = vrot.slane %v1625_v49, 4  ;;  %v473_v46 = vrot.slane %v1627_v50, 4  ;;  %v450_v0 = vadd.f32 %v449_v38, %v1613_v39 }
  0x79   : > { %v1840_v4 = vadd.f32 %v435_v11, %v434_v18  ;;  %v456_v63 = vadd.f32 %v455_v23, %v1615_v40  ;;  %v462_v8 = vadd.f32 %v461_v22, %v1617_v41  ;;  %v1845_v21 = vadd.f32 %v441_v27, %v440_v55 }
  0x7a   : > { %v445_v1 = vrot.slane %v444_v53, 2  ;;  %v468_v57 = vadd.f32 %v467_v54, %v1625_v49  ;;  %v474_v37 = vadd.f32 %v473_v46, %v1627_v50  ;;  %v451_v32 = vrot.slane %v450_v0, 2 }
  0x7b   : > { %2441 = vst [vmem:[#allocation36_spill] sm:$0xff] %v1840_v4  ;;  %2442 = vst [vmem:[#allocation37_spill] sm:$0xff] %v1845_v21  ;;  %v457_v58 = vrot.slane %v456_v63, 2  ;;  %v463_v31 = vrot.slane %v462_v8, 2  ;;  %v479_v56 = vrot.slane %v1629_v51, 4  ;;  %v485_v39 = vrot.slane %v1637_v59, 4 }
  0x7c   : > { %v446_v18 = vadd.f32 %v445_v1, %v444_v53  ;;  %v469_v26 = vrot.slane %v468_v57, 2  ;;  %v475_v11 = vrot.slane %v474_v37, 2  ;;  %v452_v40 = vadd.f32 %v451_v32, %v450_v0 }
  0x7d   : > { %v458_v38 = vadd.f32 %v457_v58, %v456_v63  ;;  %v464_v41 = vadd.f32 %v463_v31, %v462_v8  ;;  %v480_v55 = vadd.f32 %v479_v56, %v1629_v51  ;;  %v486_v50 = vadd.f32 %v485_v39, %v1637_v59 }
  0x7e   : > { %v447_v23 = vrot.slane %v446_v18, 1  ;;  %v470_v22 = vadd.f32 %v469_v26, %v468_v57  ;;  %v476_v49 = vadd.f32 %v475_v11, %v474_v37  ;;  %v453_v27 = vrot.slane %v452_v40, 1 }
  0x7f   : > { %v459_v54 = vrot.slane %v458_v38, 1  ;;  %v465_v46 = vrot.slane %v464_v41, 1  ;;  %v481_v21 = vrot.slane %v480_v55, 2  ;;  %v487_v10 = vrot.slane %v486_v50, 2 }
  0x80   : > { %v1853_v4 = vadd.f32 %v447_v23, %v446_v18  ;;  %v471_v53 = vrot.slane %v470_v22, 1  ;;  %v477_v1 = vrot.slane %v476_v49, 1  ;;  %v1855_v12 = vadd.f32 %v453_v27, %v452_v40 }
  0x81   : > { %v1857_v0 = vadd.f32 %v459_v54, %v458_v38  ;;  %v1859_v63 = vadd.f32 %v465_v46, %v464_v41  ;;  %v482_v51 = vadd.f32 %v481_v21, %v480_v55  ;;  %v488_v59 = vadd.f32 %v487_v10, %v486_v50 }
  0x82   : > { %v1861_v8 = vadd.f32 %v471_v53, %v470_v22  ;;  %v1863_v57 = vadd.f32 %v477_v1, %v476_v49  ;;  %v491_v37 = vrot.slane %v1639_v60, 4  ;;  %v497_v58 = vrot.slane %v1641_v61, 4 }
  0x83   : > { %v483_v32 = vrot.slane %v482_v51, 1  ;;  %v503_v31 = vrot.slane %v1649_v5, 4  ;;  %v509_v56 = vrot.slane %v1651_v6, 4  ;;  %v489_v18 = vrot.slane %v488_v59, 1 }
  0x84   : > { %v492_v26 = vadd.f32 %v491_v37, %v1639_v60  ;;  %v515_v11 = vrot.slane %v1653_v7, 4  ;;  %v521_v21 = vrot.slane %v1661_v15, 4  ;;  %v498_v10 = vadd.f32 %v497_v58, %v1641_v61 }
  0x85   : > { %v1872_v39 = vadd.f32 %v483_v32, %v482_v51  ;;  %v504_v40 = vadd.f32 %v503_v31, %v1649_v5  ;;  %v510_v38 = vadd.f32 %v509_v56, %v1651_v6  ;;  %v1877_v41 = vadd.f32 %v489_v18, %v488_v59 }
  0x86   : > { %v493_v55 = vrot.slane %v492_v26, 2  ;;  %v516_v23 = vadd.f32 %v515_v11, %v1653_v7  ;;  %v522_v22 = vadd.f32 %v521_v21, %v1661_v15  ;;  %v499_v60 = vrot.slane %v498_v10, 2 }
  0x87   : > { %v505_v49 = vrot.slane %v504_v40, 2  ;;  %v511_v50 = vrot.slane %v510_v38, 2  ;;  %v527_v27 = vrot.slane %v1663_v16, 4  ;;  %v533_v61 = vrot.slane %v1665_v17, 4 }
  0x88   : > { %v494_v54 = vadd.f32 %v493_v55, %v492_v26  ;;  %v517_v46 = vrot.slane %v516_v23, 2  ;;  %v523_v53 = vrot.slane %v522_v22, 2  ;;  %v500_v5 = vadd.f32 %v499_v60, %v498_v10 }
  0x89   : > { %v506_v1 = vadd.f32 %v505_v49, %v504_v40  ;;  %v512_v6 = vadd.f32 %v511_v50, %v510_v38  ;;  %v528_v51 = vadd.f32 %v527_v27, %v1663_v16  ;;  %v534_v15 = vadd.f32 %v533_v61, %v1665_v17 }
  0x8a   : > { %v495_v59 = vrot.slane %v494_v54, 1  ;;  %v518_v37 = vadd.f32 %v517_v46, %v516_v23  ;;  %v524_v7 = vadd.f32 %v523_v53, %v522_v22  ;;  %v501_v32 = vrot.slane %v500_v5, 1 }
  0x8b   : > { %v507_v58 = vrot.slane %v506_v1, 1  ;;  %v513_v31 = vrot.slane %v512_v6, 1  ;;  %v529_v56 = vrot.slane %v528_v51, 2  ;;  %v535_v21 = vrot.slane %v534_v15, 2 }
  0x8c   : > { %v1885_v18 = vadd.f32 %v495_v59, %v494_v54  ;;  %v519_v26 = vrot.slane %v518_v37, 1  ;;  %v525_v11 = vrot.slane %v524_v7, 1  ;;  %v1887_v55 = vadd.f32 %v501_v32, %v500_v5 }
  0x8d   : > { %v1889_v10 = vadd.f32 %v507_v58, %v506_v1  ;;  %v1891_v40 = vadd.f32 %v513_v31, %v512_v6  ;;  %v530_v16 = vadd.f32 %v529_v56, %v528_v51  ;;  %v536_v17 = vadd.f32 %v535_v21, %v534_v15 }
  0x8e   : > { %v1893_v38 = vadd.f32 %v519_v26, %v518_v37  ;;  %v1895_v23 = vadd.f32 %v525_v11, %v524_v7  ;;  %v539_v22 = vrot.slane %v1673_v28, 4  ;;  %v545_v49 = vrot.slane %v1675_v24, 4 }
  0x8f   : > { %v531_v60 = vrot.slane %v530_v16, 1  ;;  %v551_v50 = vrot.slane %v1677_v25, 4  ;;  %v557_v27 = vrot.slane %v1685_v47, 4  ;;  %v537_v54 = vrot.slane %v536_v17, 1 }
  0x90   : > { %v540_v46 = vadd.f32 %v539_v22, %v1673_v28  ;;  %v563_v53 = vrot.slane %v1687_v33, 4  ;;  %v569_v61 = vrot.slane %v1689_v34, 4  ;;  %v546_v1 = vadd.f32 %v545_v49, %v1675_v24 }
  0x91   : > { %v1904_v5 = vadd.f32 %v531_v60, %v530_v16  ;;  %v552_v6 = vadd.f32 %v551_v50, %v1677_v25  ;;  %v558_v51 = vadd.f32 %v557_v27, %v1685_v47  ;;  %v1909_v59 = vadd.f32 %v537_v54, %v536_v17 }
  0x92   : > { %v541_v37 = vrot.slane %v540_v46, 2  ;;  %v564_v7 = vadd.f32 %v563_v53, %v1687_v33  ;;  %v570_v15 = vadd.f32 %v569_v61, %v1689_v34  ;;  %v547_v28 = vrot.slane %v546_v1, 2 }
  0x93   : > { %v553_v32 = vrot.slane %v552_v6, 2  ;;  %v559_v58 = vrot.slane %v558_v51, 2  ;;  %v575_v31 = vrot.slane %v1697_v3, 4  ;;  %v581_v24 = vrot.slane %v1699_v43, 4 }
  0x94   : > { %v542_v56 = vadd.f32 %v541_v37, %v540_v46  ;;  %v565_v26 = vrot.slane %v564_v7, 2  ;;  %v571_v11 = vrot.slane %v570_v15, 2  ;;  %v548_v25 = vadd.f32 %v547_v28, %v546_v1 }
  0x95   : > { %v554_v21 = vadd.f32 %v553_v32, %v552_v6  ;;  %v560_v47 = vadd.f32 %v559_v58, %v558_v51  ;;  %v576_v16 = vadd.f32 %v575_v31, %v1697_v3  ;;  %v582_v34 = vadd.f32 %v581_v24, %v1699_v43  ;;  %v2449_v58 = vld [vmem:[#allocation15_spill] sm:$0xff] }
  0x96   : > { %v543_v17 = vrot.slane %v542_v56, 1  ;;  %v566_v22 = vadd.f32 %v565_v26, %v564_v7  ;;  %v572_v33 = vadd.f32 %v571_v11, %v570_v15  ;;  %v549_v60 = vrot.slane %v548_v25, 1  ;;  %v2448_v15 = vld [vmem:[#allocation14_spill] sm:$0xff]  ;;  %v2451_v11 = vld [vmem:[#allocation17_spill] sm:$0xff] }
  0x97   : > { %v555_v49 = vrot.slane %v554_v21, 1  ;;  %v561_v50 = vrot.slane %v560_v47, 1  ;;  %v577_v27 = vrot.slane %v576_v16, 2  ;;  %v583_v61 = vrot.slane %v582_v34, 2 }
  0x98   : > { %v1917_v54 = vadd.f32 %v543_v17, %v542_v56  ;;  %v567_v46 = vrot.slane %v566_v22, 1  ;;  %v573_v53 = vrot.slane %v572_v33, 1  ;;  %v1919_v37 = vadd.f32 %v549_v60, %v548_v25  ;;  %v2450_v56 = vld [vmem:[#allocation16_spill] sm:$0xff] }
  0x99   : > { %v1921_v1 = vadd.f32 %v555_v49, %v554_v21  ;;  %v1923_v6 = vadd.f32 %v561_v50, %v560_v47  ;;  %v578_v3 = vadd.f32 %v577_v27, %v576_v16  ;;  %v584_v43 = vadd.f32 %v583_v61, %v582_v34  ;;  %v2452_v47 = vld [vmem:[#allocation18_spill] sm:$0xff]  ;;  %v2453_v16 = vld [vmem:[#allocation19_spill] sm:$0xff] }
  0x9a   : > { %2443 = vst [vmem:[#allocation38_spill] sm:$0xff] %v1919_v37  ;;  %v1925_v51 = vadd.f32 %v567_v46, %v566_v22  ;;  %v1927_v7 = vadd.f32 %v573_v53, %v572_v33  ;;  %v587_v28 = vrot.slane %v2448_v15, 4  ;;  %v593_v31 = vrot.slane %v2449_v58, 4 }
  0x9b   : > { %2444 = vst [vmem:[#allocation39_spill] sm:$0xff] %v1921_v1  ;;  %2445 = vst [vmem:[#allocation40_spill] sm:$0xff] %v1923_v6  ;;  %v579_v32 = vrot.slane %v578_v3, 1  ;;  %v599_v26 = vrot.slane %v2450_v56, 4  ;;  %v605_v24 = vrot.slane %v2451_v11, 4  ;;  %v585_v25 = vrot.slane %v584_v43, 1 }
  0x9c   : > { %2446 = vst [vmem:[#allocation41_spill] sm:$0xff] %v1925_v51  ;;  %2447 = vst [vmem:[#allocation42_spill] sm:$0xff] %v1927_v7  ;;  %v588_v21 = vadd.f32 %v587_v28, %v2448_v15  ;;  %v611_v17 = vrot.slane %v2452_v47, 4  ;;  %v617_v22 = vrot.slane %v2453_v16, 4  ;;  %v594_v33 = vadd.f32 %v593_v31, %v2449_v58  ;;  %v2456_v7 = vld [vmem:[#allocation20_spill] sm:$0xff] }
  0x9d   : > { %v1936_v60 = vadd.f32 %v579_v32, %v578_v3  ;;  %v600_v34 = vadd.f32 %v599_v26, %v2450_v56  ;;  %v606_v49 = vadd.f32 %v605_v24, %v2451_v11  ;;  %v1941_v50 = vadd.f32 %v585_v25, %v584_v43 }
  0x9e   : > { %v589_v27 = vrot.slane %v588_v21, 2  ;;  %v612_v46 = vadd.f32 %v611_v17, %v2452_v47  ;;  %v618_v53 = vadd.f32 %v617_v22, %v2453_v16  ;;  %v595_v61 = vrot.slane %v594_v33, 2 }
  0x9f   : > { %2454 = vst [vmem:[#allocation14_spill] sm:$0xff] %v1936_v60  ;;  %2455 = vst [vmem:[#allocation15_spill] sm:$0xff] %v1941_v50  ;;  %v601_v15 = vrot.slane %v600_v34, 2  ;;  %v607_v28 = vrot.slane %v606_v49, 2  ;;  %v623_v51 = vrot.slane %v2456_v7, 4  ;;  %v629_v58 = vrot.slane %v1733_v44, 4 }
  0xa0   : > { %v590_v3 = vadd.f32 %v589_v27, %v588_v21  ;;  %v613_v32 = vrot.slane %v612_v46, 2  ;;  %v619_v60 = vrot.slane %v618_v53, 2  ;;  %v596_v31 = vadd.f32 %v595_v61, %v594_v33 }
  0xa1   : > { %v602_v56 = vadd.f32 %v601_v15, %v600_v34  ;;  %v608_v26 = vadd.f32 %v607_v28, %v606_v49  ;;  %v624_v43 = vadd.f32 %v623_v51, %v2456_v7  ;;  %v630_v47 = vadd.f32 %v629_v58, %v1733_v44  ;;  %v2463_v15 = vld [vmem:[#allocation23_spill] sm:$0xff] }
  0xa2   : > { %v591_v11 = vrot.slane %v590_v3, 1  ;;  %v614_v24 = vadd.f32 %v613_v32, %v612_v46  ;;  %v620_v25 = vadd.f32 %v619_v60, %v618_v53  ;;  %v597_v17 = vrot.slane %v596_v31, 1  ;;  %v2462_v53 = vld [vmem:[#allocation21_spill] sm:$0xff] }
  0xa3   : > { %v603_v16 = vrot.slane %v602_v56, 1  ;;  %v609_v22 = vrot.slane %v608_v26, 1  ;;  %v625_v50 = vrot.slane %v624_v43, 2  ;;  %v631_v1 = vrot.slane %v630_v47, 2 }
  0xa4   : > { %v1949_v6 = vadd.f32 %v591_v11, %v590_v3  ;;  %v615_v21 = vrot.slane %v614_v24, 1  ;;  %v621_v27 = vrot.slane %v620_v25, 1  ;;  %v1951_v37 = vadd.f32 %v597_v17, %v596_v31  ;;  %v2464_v3 = vld [vmem:[#allocation24_spill] sm:$0xff] }
  0xa5   : > { %v1953_v33 = vadd.f32 %v603_v16, %v602_v56  ;;  %v1955_v34 = vadd.f32 %v609_v22, %v608_v26  ;;  %v626_v51 = vadd.f32 %v625_v50, %v624_v43  ;;  %v632_v44 = vadd.f32 %v631_v1, %v630_v47  ;;  %v2465_v56 = vld [vmem:[#allocation25_spill] sm:$0xff]  ;;  %v2466_v50 = vld [vmem:[#allocation27_spill] sm:$0xff] }
  0xa6   : > { %2457 = vst [vmem:[#allocation16_spill] sm:$0xff] %v1951_v37  ;;  %v1957_v7 = vadd.f32 %v615_v21, %v614_v24  ;;  %v1959_v60 = vadd.f32 %v621_v27, %v620_v25  ;;  %v635_v49 = vrot.slane %v1735_v9, 4  ;;  %v641_v61 = vrot.slane %v2462_v53, 4 }
  0xa7   : > { %2458 = vst [vmem:[#allocation17_spill] sm:$0xff] %v1953_v33  ;;  %2459 = vst [vmem:[#allocation18_spill] sm:$0xff] %v1955_v34  ;;  %v627_v46 = vrot.slane %v626_v51, 1  ;;  %v647_v28 = vrot.slane %v2463_v15, 4  ;;  %v653_v32 = vrot.slane %v2464_v3, 4  ;;  %v633_v58 = vrot.slane %v632_v44, 1 }
  0xa8   : > { %2460 = vst [vmem:[#allocation19_spill] sm:$0xff] %v1957_v7  ;;  %2461 = vst [vmem:[#allocation20_spill] sm:$0xff] %v1959_v60  ;;  %v636_v31 = vadd.f32 %v635_v49, %v1735_v9  ;;  %v659_v26 = vrot.slane %v2465_v56, 4  ;;  %v665_v43 = vrot.slane %v2466_v50, 4  ;;  %v642_v1 = vadd.f32 %v641_v61, %v2462_v53  ;;  %v2469_v49 = vld [vmem:[#allocation28_spill] sm:$0xff]  ;;  %v2470_v53 = vld [vmem:[#allocation29_spill] sm:$0xff] }
  0xa9   : > { %v1968_v11 = vadd.f32 %v627_v46, %v626_v51  ;;  %v648_v24 = vadd.f32 %v647_v28, %v2463_v15  ;;  %v654_v25 = vadd.f32 %v653_v32, %v2464_v3  ;;  %v1973_v47 = vadd.f32 %v633_v58, %v632_v44 }
  0xaa   : > { %v637_v17 = vrot.slane %v636_v31, 2  ;;  %v660_v16 = vadd.f32 %v659_v26, %v2465_v56  ;;  %v666_v22 = vadd.f32 %v665_v43, %v2466_v50  ;;  %v643_v9 = vrot.slane %v642_v1, 2 }
  0xab   : > { %2467 = vst [vmem:[#allocation21_spill] sm:$0xff] %v1968_v11  ;;  %2468 = vst [vmem:[#allocation23_spill] sm:$0xff] %v1973_v47  ;;  %v649_v21 = vrot.slane %v648_v24, 2  ;;  %v655_v27 = vrot.slane %v654_v25, 2  ;;  %v671_v60 = vrot.slane %v2469_v49, 4  ;;  %v677_v61 = vrot.slane %v2470_v53, 4 }
  0xac   : > { %v638_v51 = vadd.f32 %v637_v17, %v636_v31  ;;  %v661_v46 = vrot.slane %v660_v16, 2  ;;  %v667_v11 = vrot.slane %v666_v22, 2  ;;  %v644_v15 = vadd.f32 %v643_v9, %v642_v1 }
  0xad   : > { %v650_v28 = vadd.f32 %v649_v21, %v648_v24  ;;  %v656_v3 = vadd.f32 %v655_v27, %v654_v25  ;;  %v672_v44 = vadd.f32 %v671_v60, %v2469_v49  ;;  %v678_v26 = vadd.f32 %v677_v61, %v2470_v53  ;;  %v2472_v21 = vld [vmem:[#allocation30_spill] sm:$0xff]  ;;  %v2473_v49 = vld [vmem:[#allocation31_spill] sm:$0xff] }
  0xae   : > { %v639_v32 = vrot.slane %v638_v51, 1  ;;  %v662_v58 = vadd.f32 %v661_v46, %v660_v16  ;;  %v668_v56 = vadd.f32 %v667_v11, %v666_v22  ;;  %v645_v50 = vrot.slane %v644_v15, 1 }
  0xaf   : > { %v651_v43 = vrot.slane %v650_v28, 1  ;;  %v657_v47 = vrot.slane %v656_v3, 1  ;;  %v673_v7 = vrot.slane %v672_v44, 2  ;;  %v679_v33 = vrot.slane %v678_v26, 2 }
  0xb0   : > { %v1981_v34 = vadd.f32 %v639_v32, %v638_v51  ;;  %v663_v31 = vrot.slane %v662_v58, 1  ;;  %v669_v17 = vrot.slane %v668_v56, 1  ;;  %v1983_v37 = vadd.f32 %v645_v50, %v644_v15 }
  0xb1   : > { %v1985_v1 = vadd.f32 %v651_v43, %v650_v28  ;;  %v1987_v24 = vadd.f32 %v657_v47, %v656_v3  ;;  %v674_v60 = vadd.f32 %v673_v7, %v672_v44  ;;  %v680_v16 = vadd.f32 %v679_v33, %v678_v26 }
  0xb2   : > { %v1989_v25 = vadd.f32 %v663_v31, %v662_v58  ;;  %v1991_v11 = vadd.f32 %v669_v17, %v668_v56  ;;  %v683_v22 = vrot.slane %v1774_v48, 4  ;;  %v689_v27 = vrot.slane %v2472_v21, 4 }
  0xb3   : > { %v675_v9 = vrot.slane %v674_v60, 1  ;;  %v695_v51 = vrot.slane %v2473_v49, 4  ;;  %v701_v46 = vrot.slane %v1786_v20, 4  ;;  %v681_v53 = vrot.slane %v680_v16, 1 }
  0xb4   : > { %2471 = vst [vmem:[#allocation24_spill] sm:$0xff] %v1991_v11  ;;  %v684_v61 = vadd.f32 %v683_v22, %v1774_v48  ;;  %v707_v47 = vrot.slane %v1788_v19, 4  ;;  %v713_v7 = vrot.slane %v1790_v62, 4  ;;  %v690_v33 = vadd.f32 %v689_v27, %v2472_v21  ;;  %v2476_v22 = vld [vmem:[#allocation32_spill] sm:$0xff] }
  0xb5   : > { %v2000_v15 = vadd.f32 %v675_v9, %v674_v60  ;;  %v696_v28 = vadd.f32 %v695_v51, %v2473_v49  ;;  %v702_v3 = vadd.f32 %v701_v46, %v1786_v20  ;;  %v2005_v44 = vadd.f32 %v681_v53, %v680_v16 }
  0xb6   : > { %v685_v32 = vrot.slane %v684_v61, 2  ;;  %v708_v58 = vadd.f32 %v707_v47, %v1788_v19  ;;  %v714_v56 = vadd.f32 %v713_v7, %v1790_v62  ;;  %v691_v48 = vrot.slane %v690_v33, 2 }
  0xb7   : > { %2474 = vst [vmem:[#allocation25_spill] sm:$0xff] %v2000_v15  ;;  %2475 = vst [vmem:[#allocation27_spill] sm:$0xff] %v2005_v44  ;;  %v697_v26 = vrot.slane %v696_v28, 2  ;;  %v703_v50 = vrot.slane %v702_v3, 2  ;;  %v719_v43 = vrot.slane %v1796_v42, 4  ;;  %v725_v9 = vrot.slane %v2476_v22, 4 }
  0xb8   : > { %v686_v31 = vadd.f32 %v685_v32, %v684_v61  ;;  %v709_v17 = vrot.slane %v708_v58, 2  ;;  %v715_v60 = vrot.slane %v714_v56, 2  ;;  %v692_v21 = vadd.f32 %v691_v48, %v690_v33  ;;  %v2477_v48 = vld [vmem:[#allocation33_spill] sm:$0xff] }
  0xb9   : > { %v698_v27 = vadd.f32 %v697_v26, %v696_v28  ;;  %v704_v20 = vadd.f32 %v703_v50, %v702_v3  ;;  %v720_v16 = vadd.f32 %v719_v43, %v1796_v42  ;;  %v726_v62 = vadd.f32 %v725_v9, %v2476_v22 }
  0xba   : > { %v687_v49 = vrot.slane %v686_v31, 1  ;;  %v710_v51 = vadd.f32 %v709_v17, %v708_v58  ;;  %v716_v19 = vadd.f32 %v715_v60, %v714_v56  ;;  %v693_v46 = vrot.slane %v692_v21, 1 }
  0xbb   : > { %v699_v53 = vrot.slane %v698_v27, 1  ;;  %v705_v47 = vrot.slane %v704_v20, 1  ;;  %v721_v7 = vrot.slane %v720_v16, 2  ;;  %v727_v15 = vrot.slane %v726_v62, 2 }
  0xbc   : > { %v2013_v44 = vadd.f32 %v687_v49, %v686_v31  ;;  %v711_v61 = vrot.slane %v710_v51, 1  ;;  %v717_v32 = vrot.slane %v716_v19, 1  ;;  %v2015_v11 = vadd.f32 %v693_v46, %v692_v21 }
  0xbd   : > { %v2017_v33 = vadd.f32 %v699_v53, %v698_v27  ;;  %v2019_v28 = vadd.f32 %v705_v47, %v704_v20  ;;  %v722_v42 = vadd.f32 %v721_v7, %v720_v16  ;;  %v728_v56 = vadd.f32 %v727_v15, %v726_v62 }
  0xbe   : > { %v2021_v3 = vadd.f32 %v711_v61, %v710_v51  ;;  %v2023_v58 = vadd.f32 %v717_v32, %v716_v19  ;;  %v731_v26 = vrot.slane %v2477_v48, 4  ;;  %v737_v43 = vrot.slane %v1806_v35, 4 }
  0xbf   : > { %v723_v50 = vrot.slane %v722_v42, 1  ;;  %v743_v31 = vrot.slane %v1808_v30, 4  ;;  %v749_v17 = vrot.slane %v1810_v45, 4  ;;  %v729_v60 = vrot.slane %v728_v56, 1 }
  0xc0   : > { %v732_v22 = vadd.f32 %v731_v26, %v2477_v48  ;;  %v755_v9 = vrot.slane %v1815_v36, 4  ;;  %v761_v21 = vrot.slane %v1817_v2, 4  ;;  %v738_v15 = vadd.f32 %v737_v43, %v1806_v35 }
  0xc1   : > { %v2032_v27 = vadd.f32 %v723_v50, %v722_v42  ;;  %v744_v20 = vadd.f32 %v743_v31, %v1808_v30  ;;  %v750_v16 = vadd.f32 %v749_v17, %v1810_v45  ;;  %v2037_v49 = vadd.f32 %v729_v60, %v728_v56 }
  0xc2   : > { %v733_v51 = vrot.slane %v732_v22, 2  ;;  %v756_v19 = vadd.f32 %v755_v9, %v1815_v36  ;;  %v762_v62 = vadd.f32 %v761_v21, %v1817_v2  ;;  %v739_v46 = vrot.slane %v738_v15, 2 }
  0xc3   : > { %2478 = vst [vmem:[#allocation28_spill] sm:$0xff] %v2037_v49  ;;  %v745_v53 = vrot.slane %v744_v20, 2  ;;  %v751_v47 = vrot.slane %v750_v16, 2  ;;  %v767_v7 = vrot.slane %v1819_v29, 4  ;;  %v773_v35 = vrot.slane %v1823_v52, 4 }
  0xc4   : > { %v734_v61 = vadd.f32 %v733_v51, %v732_v22  ;;  %v757_v32 = vrot.slane %v756_v19, 2  ;;  %v763_v42 = vrot.slane %v762_v62, 2  ;;  %v740_v30 = vadd.f32 %v739_v46, %v738_v15 }
  0xc5   : > { %v746_v48 = vadd.f32 %v745_v53, %v744_v20  ;;  %v752_v45 = vadd.f32 %v751_v47, %v750_v16  ;;  %v768_v56 = vadd.f32 %v767_v7, %v1819_v29  ;;  %v774_v2 = vadd.f32 %v773_v35, %v1823_v52  ;;  %v2479_v47 = vld [vmem:[#allocation34_spill] sm:$0xff] }
  0xc6   : > { %v735_v26 = vrot.slane %v734_v61, 1  ;;  %v758_v50 = vadd.f32 %v757_v32, %v756_v19  ;;  %v764_v36 = vadd.f32 %v763_v42, %v762_v62  ;;  %v741_v43 = vrot.slane %v740_v30, 1 }
  0xc7   : > { %v747_v31 = vrot.slane %v746_v48, 1  ;;  %v753_v17 = vrot.slane %v752_v45, 1  ;;  %v769_v60 = vrot.slane %v768_v56, 2  ;;  %v775_v51 = vrot.slane %v774_v2, 2 }
  0xc8   : > { %v2045_v9 = vadd.f32 %v735_v26, %v734_v61  ;;  %v759_v22 = vrot.slane %v758_v50, 1  ;;  %v765_v21 = vrot.slane %v764_v36, 1  ;;  %v2047_v49 = vadd.f32 %v741_v43, %v740_v30  ;;  %v2480_v61 = vld [vmem:[#allocation35_spill] sm:$0xff]  ;;  %v2481_v30 = vld [vmem:[#allocation22_spill] sm:$0xff] }
  0xc9   : > { %v2049_v15 = vadd.f32 %v747_v31, %v746_v48  ;;  %v2051_v20 = vadd.f32 %v753_v17, %v752_v45  ;;  %v770_v29 = vadd.f32 %v769_v60, %v768_v56  ;;  %v776_v52 = vadd.f32 %v775_v51, %v774_v2  ;;  %v2482_v45 = vld [vmem:[#allocation26_spill] sm:$0xff]  ;;  %v2483_v17 = vld [vmem:[#allocation36_spill] sm:$0xff] }
  0xca   : > { %v2053_v16 = vadd.f32 %v759_v22, %v758_v50  ;;  %v2055_v19 = vadd.f32 %v765_v21, %v764_v36  ;;  %v779_v62 = vrot.slane %v1825_v13, 4  ;;  %v785_v53 = vrot.slane %v1827_v14, 4 }
  0xcb   : > { %v771_v46 = vrot.slane %v770_v29, 1  ;;  %v791_v7 = vrot.slane %v2479_v47, 4  ;;  %v797_v32 = vrot.slane %v2480_v61, 4  ;;  %v777_v42 = vrot.slane %v776_v52, 1 }
  0xcc   : > { %v780_v35 = vadd.f32 %v779_v62, %v1825_v13  ;;  %v2063_v48 = vmul.f32 0.125, %v2481_v30  ;;  %v2066_v56 = vmul.f32 0.125, %v2482_v45  ;;  %v786_v50 = vadd.f32 %v785_v53, %v1827_v14  ;;  %v2484_v13 = vld [vmem:[#allocation37_spill] sm:$0xff] }
  0xcd   : > { %v2068_v26 = vadd.f32 %v771_v46, %v770_v29  ;;  %v792_v36 = vadd.f32 %v791_v7, %v2479_v47  ;;  %v798_v2 = vadd.f32 %v797_v32, %v2480_v61  ;;  %v2073_v43 = vadd.f32 %v777_v42, %v776_v52 }
  0xce   : > { %v781_v31 = vrot.slane %v780_v35, 2  ;;  %v2076_v60 = vmul.f32 0.125, %v2483_v17  ;;  %v2079_v22 = vmul.f32 0.125, %v2484_v13  ;;  %v787_v21 = vrot.slane %v786_v50, 2 }
  0xcf   : > { %v793_v51 = vrot.slane %v792_v36, 2  ;;  %v799_v62 = vrot.slane %v798_v2, 2  ;;  %v2082_v29 = vmul.f32 0.125, %v1853_v4  ;;  %v2085_v46 = vmul.f32 0.125, %v1855_v12 }
  0xd0   : > { %v782_v14 = vadd.f32 %v781_v31, %v780_v35  ;;  %v2088_v52 = vmul.f32 0.125, %v1857_v0  ;;  %v2091_v53 = vmul.f32 0.125, %v1859_v63  ;;  %v788_v47 = vadd.f32 %v787_v21, %v786_v50 }
  0xd1   : > { %v794_v7 = vadd.f32 %v793_v51, %v792_v36  ;;  %v800_v61 = vadd.f32 %v799_v62, %v798_v2  ;;  %v2094_v32 = vmul.f32 0.125, %v1861_v8  ;;  %v2097_v4 = vmul.f32 0.125, %v1863_v57  ;;  %v2490_v62 = vld [vmem:[#allocation40_spill] sm:$0xff] }
  0xd2   : > { %2485 = vst [vmem:[#allocation29_spill] sm:$0xff] %v2091_v53  ;;  %v783_v42 = vrot.slane %v782_v14, 1  ;;  %v2100_v35 = vmul.f32 0.125, %v1872_v39  ;;  %v2103_v12 = vmul.f32 0.125, %v1877_v41  ;;  %v789_v0 = vrot.slane %v788_v47, 1 }
  0xd3   : > { %v795_v30 = vrot.slane %v794_v7, 1  ;;  %v801_v63 = vrot.slane %v800_v61, 1  ;;  %v2106_v45 = vmul.f32 0.125, %v1885_v18  ;;  %v2109_v8 = vmul.f32 0.125, %v1887_v55 }
  0xd4   : > { %v784_v50 = vadd.f32 %v783_v42, %v782_v14  ;;  %v2112_v36 = vmul.f32 0.125, %v1889_v10  ;;  %v2115_v57 = vmul.f32 0.125, %v1891_v40  ;;  %v790_v39 = vadd.f32 %v789_v0, %v788_v47  ;;  %v2487_v10 = vld [vmem:[#allocation38_spill] sm:$0xff]  ;;  %v2488_v40 = vld [vmem:[#allocation39_spill] sm:$0xff]  ;;  %v2496_v0 = vld [vmem:[#allocation16_spill] sm:$0xff] }
  0xd5   : > { %v796_v2 = vadd.f32 %v795_v30, %v794_v7  ;;  %v802_v41 = vadd.f32 %v801_v63, %v800_v61  ;;  %v819_v31 = vmul.f32 0.125, %v1893_v38  ;;  %v820_v17 = vmul.f32 0.125, %v1895_v23  ;;  %v2492_v38 = vld [vmem:[#allocation41_spill] sm:$0xff]  ;;  %v2495_v61 = vld [vmem:[#allocation15_spill] sm:$0xff] }
  0xd6   : > { %2486 = vst [vmem:[#allocation30_spill] sm:$0xff] %v2115_v57  ;;  %v821_v18 = vmul.f32 0.125, %v1904_v5  ;;  %v2121_v13 = vmul.f32 0.125, %v1909_v59  ;;  %v2124_v55 = vmul.f32 0.125, %v1917_v54  ;;  %v2127_v21 = vmul.f32 0.125, %v2487_v10  ;;  %v2493_v5 = vld [vmem:[#allocation42_spill] sm:$0xff] }
  0xd7   : > { %v2130_v51 = vmul.f32 0.125, %v2488_v40  ;;  %v2133_v14 = vmul.f32 0.125, %v2490_v62  ;;  %v827_v23 = vmul.f32 0.125, %v2492_v38  ;;  %v828_v47 = vmul.f32 0.125, %v2493_v5  ;;  %v2494_v59 = vld [vmem:[#allocation14_spill] sm:$0xff]  ;;  %v2498_v63 = vld [vmem:[#allocation17_spill] sm:$0xff] }
  0xd8   : > { %v829_v7 = vmul.f32 0.125, %v2494_v59  ;;  %v830_v54 = vmul.f32 0.125, %v2495_v61  ;;  %v2140_v42 = vmul.f32 0.125, %v1949_v6  ;;  %v2143_v30 = vmul.f32 0.125, %v2496_v0  ;;  %v2500_v40 = vld [vmem:[#allocation18_spill] sm:$0xff]  ;;  %v2502_v38 = vld [vmem:[#allocation19_spill] sm:$0xff] }
  0xd9   : > { %2489 = vst [vmem:[#allocation31_spill] sm:$0xff] %v2130_v51  ;;  %2491 = vst [vmem:[#allocation32_spill] sm:$0xff] %v2133_v14  ;;  %v2146_v10 = vmul.f32 0.125, %v2498_v63  ;;  %v2149_v62 = vmul.f32 0.125, %v2500_v40  ;;  %v835_v14 = vmul.f32 0.125, %v2502_v38  ;;  %v2503_v5 = vld [vmem:[#allocation20_spill] sm:$0xff] }
  0xda   : > { %2497 = vst [vmem:[#allocation33_spill] sm:$0xff] %v2143_v30  ;;  %v836_v57 = vmul.f32 0.125, %v2503_v5  ;;  %v2504_v59 = vld [vmem:[#allocation21_spill] sm:$0xff]  ;;  %v2505_v61 = vld [vmem:[#allocation23_spill] sm:$0xff]  ;;  %v2156_v6 = vmul.f32 0.125, %v1981_v34  ;;  %v2159_v0 = vmul.f32 0.125, %v1983_v37 }
  0xdb   : > { %2499 = vst [vmem:[#allocation34_spill] sm:$0xff] %v2146_v10  ;;  %2501 = vst [vmem:[#allocation35_spill] sm:$0xff] %v2149_v62  ;;  %v837_v53 = vmul.f32 0.125, %v2504_v59  ;;  %v838_v51 = vmul.f32 0.125, %v2505_v61  ;;  %v2162_v63 = vmul.f32 0.125, %v1985_v1  ;;  %v2165_v40 = vmul.f32 0.125, %v1987_v24 }
  0xdc   : > { %v843_v38 = vmul.f32 0.125, %v1989_v25  ;;  %v2507_v62 = vld [vmem:[#allocation24_spill] sm:$0xff]  ;;  %v2508_v10 = vld [vmem:[#allocation25_spill] sm:$0xff]  ;;  %v2509_v30 = vld [vmem:[#allocation27_spill] sm:$0xff]  ;;  %v2172_v34 = vmul.f32 0.125, %v2013_v44  ;;  %v2175_v37 = vmul.f32 0.125, %v2015_v11 }
  0xdd   : > { %2506 = vst [vmem:[#allocation22_spill] sm:$0xff] %v2165_v40  ;;  %v844_v5 = vmul.f32 0.125, %v2507_v62  ;;  %v845_v59 = vmul.f32 0.125, %v2508_v10  ;;  %v846_v61 = vmul.f32 0.125, %v2509_v30  ;;  %v2178_v1 = vmul.f32 0.125, %v2017_v33  ;;  %v2511_v30 = vld [vmem:[#allocation28_spill] sm:$0xff] }
  0xde   : > { %v2181_v24 = vmul.f32 0.125, %v2019_v28  ;;  %v851_v25 = vmul.f32 0.125, %v2021_v3  ;;  %v852_v62 = vmul.f32 0.125, %v2023_v58  ;;  %v853_v10 = vmul.f32 0.125, %v2032_v27 }
  0xdf   : > { %v854_v40 = vmul.f32 0.125, %v2511_v30  ;;  %v2188_v44 = vmul.f32 0.125, %v2045_v9  ;;  %v2191_v11 = vmul.f32 0.125, %v2047_v49  ;;  %v2194_v33 = vmul.f32 0.125, %v2049_v15 }
  0xe0   : > { %2510 = vst [vmem:[#allocation26_spill] sm:$0xff] %v2181_v24  ;;  %v2197_v28 = vmul.f32 0.125, %v2051_v20  ;;  %v859_v3 = vmul.f32 0.125, %v2053_v16  ;;  %v860_v58 = vmul.f32 0.125, %v2055_v19  ;;  %v861_v27 = vmul.f32 0.125, %v2068_v26 }
  0xe1   : > { %2512 = vst [vmem:[#allocation36_spill] sm:$0xff] %v2191_v11  ;;  %v862_v30 = vmul.f32 0.125, %v2073_v43  ;;  %v2203_v24 = vmul.f32 0.125, %v784_v50  ;;  %v2205_v9 = vmul.f32 0.125, %v790_v39  ;;  %v2207_v49 = vmul.f32 0.125, %v796_v2 }
  0xe2   : > { %v2209_v11 = vmul.f32 0.125, %v802_v41  ;;  %v932_v15 = vsel %vm931_vm0, %v2094_v32, %v2063_v48  ;;  %v945_v19 = vsel %vm931_vm0, %v2097_v4, %v2066_v56  ;;  %v952_v26 = vsel %vm931_vm0, %v2100_v35, %v2076_v60 }
  0xe3   : > { %v934_v20 = vsel %vm933_vm1, %v819_v31, %v932_v15  ;;  %v946_v48 = vsel %vm933_vm1, %v820_v17, %v945_v19  ;;  %v953_v32 = vsel %vm933_vm1, %v821_v18, %v952_v26  ;;  %v959_v50 = vsel %vm931_vm0, %v2103_v12, %v2079_v22 }
  0xe4   : > { %v936_v16 = vsel %vm935_vm2, %v827_v23, %v934_v20  ;;  %v947_v56 = vsel %vm935_vm2, %v828_v47, %v946_v48  ;;  %v954_v4 = vsel %vm935_vm2, %v829_v7, %v953_v32  ;;  %v960_v60 = vsel %vm933_vm1, %v2121_v13, %v959_v50  ;;  %v2520_v15 = vld [vmem:[#allocation22_spill] sm:$0xff] }
  0xe5   : > { %v938_v43 = vsel %vm937_vm3, %v835_v14, %v936_v16  ;;  %v948_v2 = vsel %vm937_vm3, %v836_v57, %v947_v56  ;;  %v955_v41 = vsel %vm937_vm3, %v837_v53, %v954_v4  ;;  %v961_v31 = vsel %vm935_vm2, %v830_v54, %v960_v60 }
  0xe6   : > { %v940_v39 = vsel %vm939_vm4, %v843_v38, %v938_v43  ;;  %v949_v12 = vsel %vm939_vm4, %v844_v5, %v948_v2  ;;  %v956_v17 = vsel %vm939_vm4, %v845_v59, %v955_v41  ;;  %v962_v18 = vsel %vm937_vm3, %v838_v51, %v961_v31  ;;  %v2513_v5 = vld [vmem:[#allocation31_spill] sm:$0xff]  ;;  %v2514_v59 = vld [vmem:[#allocation29_spill] sm:$0xff] }
  0xe7   : > { %v942_v35 = vsel %vm941_vm5, %v851_v25, %v940_v39  ;;  %v950_v13 = vsel %vm941_vm5, %v852_v62, %v949_v12  ;;  %v957_v14 = vsel %vm941_vm5, %v853_v10, %v956_v17  ;;  %v963_v57 = vsel %vm939_vm4, %v846_v61, %v962_v18  ;;  %v2515_v61 = vld [vmem:[#allocation30_spill] sm:$0xff]  ;;  %v2518_v62 = vld [vmem:[#allocation32_spill] sm:$0xff] }
  0xe8   : > { %v944_v22 = vsel %vm943_vm6, %v859_v3, %v942_v35  ;;  %v966_v53 = vsel %vm931_vm0, %v2106_v45, %v2082_v29  ;;  %v951_v51 = vsel %vm943_vm6, %v860_v58, %v950_v13  ;;  %v958_v23 = vsel %vm943_vm6, %v861_v27, %v957_v14  ;;  %v2517_v25 = vld [vmem:[#allocation34_spill] sm:$0xff]  ;;  %v2521_v20 = vld [vmem:[#allocation36_spill] sm:$0xff] }
  0xe9   : > { %1002 = vst [vmem:[%s2252_s8] sm:$0xff] %v944_v22  ;;  %v964_v47 = vsel %vm941_vm5, %v854_v40, %v963_v57  ;;  %v967_v7 = vsel %vm933_vm1, %v2124_v55, %v966_v53  ;;  %v973_v45 = vsel %vm931_vm0, %v2109_v8, %v2085_v46  ;;  %v980_v38 = vsel %vm931_vm0, %v2112_v36, %v2088_v52  ;;  %v2516_v8 = vld [vmem:[#allocation33_spill] sm:$0xff]  ;;  %v2522_v26 = vld [vmem:[#allocation26_spill] sm:$0xff] }
  0xea   : > { %v965_v54 = vsel %vm943_vm6, %v862_v30, %v964_v47  ;;  %v968_v29 = vsel %vm935_vm2, %v2140_v42, %v967_v7  ;;  %1003 = vst [vmem:[%s2252_s8 + $0x8] sm:$0xff] %v951_v51  ;;  %1004 = vst [vmem:[%s2252_s8 + $0x10] sm:$0xff] %v958_v23  ;;  %v974_v40 = vsel %vm933_vm1, %v2127_v21, %v973_v45 }
  0xeb   : > { %v969_v55 = vsel %vm937_vm3, %v2156_v6, %v968_v29  ;;  %v981_v42 = vsel %vm933_vm1, %v2513_v5, %v980_v38  ;;  %v987_v46 = vsel %vm931_vm0, %v2515_v61, %v2514_v59  ;;  %1005 = vst [vmem:[%s2252_s8 + $0x18] sm:$0xff] %v965_v54  ;;  %v975_v36 = vsel %vm935_vm2, %v2516_v8, %v974_v40 }
  0xec   : > { %v970_v52 = vsel %vm939_vm4, %v2172_v34, %v969_v55  ;;  %v982_v6 = vsel %vm935_vm2, %v2517_v25, %v981_v42  ;;  %v988_v21 = vsel %vm933_vm1, %v2518_v62, %v987_v46  ;;  %v976_v3 = vsel %vm937_vm3, %v2159_v0, %v975_v36  ;;  %v2519_v34 = vld [vmem:[#allocation35_spill] sm:$0xff] }
  0xed   : > { %v971_v10 = vsel %vm941_vm5, %v2188_v44, %v970_v52  ;;  %v983_v58 = vsel %vm937_vm3, %v2162_v63, %v982_v6  ;;  %v989_v27 = vsel %vm935_vm2, %v2519_v34, %v988_v21  ;;  %v977_v44 = vsel %vm939_vm4, %v2175_v37, %v976_v3 }
  0xee   : > { %v972_v30 = vsel %vm943_vm6, %v2203_v24, %v971_v10  ;;  %v984_v0 = vsel %vm939_vm4, %v2178_v1, %v983_v58  ;;  %v990_v63 = vsel %vm937_vm3, %v2520_v15, %v989_v27  ;;  %v978_v16 = vsel %vm941_vm5, %v2521_v20, %v977_v44 }
  0xef   : > { %v985_v19 = vsel %vm941_vm5, %v2194_v33, %v984_v0  ;;  %v991_v24 = vsel %vm939_vm4, %v2522_v26, %v990_v63  ;;  %1006 = vst [vmem:[%s2252_s8 + $0x20] sm:$0xff] %v972_v30  ;;  %v979_v37 = vsel %vm943_vm6, %v2205_v9, %v978_v16 }
  0xf0   : > { %v986_v1 = vsel %vm943_vm6, %v2207_v49, %v985_v19  ;;  %v992_v43 = vsel %vm941_vm5, %v2197_v28, %v991_v24  ;;  %1007 = vst [vmem:[%s2252_s8 + $0x28] sm:$0xff] %v979_v37 }
  0xf1   : > { %v993_v33 = vsel %vm943_vm6, %v2209_v11, %v992_v43  ;;  %1008 = vst [vmem:[%s2252_s8 + $0x30] sm:$0xff] %v986_v1 }
  0xf2   : > { %1009 = vst [vmem:[%s2252_s8 + $0x38] sm:$0xff] %v993_v33 }
  0xf3   : > { %1317 = shalt.err (!%p1314_p6)
}
  0xf4   : > { %s1318_s29 = scalar_lea.hbm %s2322_s5, 1024  ;;  %s1322_s27 = scalar_lea.hbm %s2382_s2, 8192 }
  0xf5   : > { %p1319_p3 = scmp.ne.s32.totalorder %s2322_s5, %s1318_s29  ;;  %p1323_p10 = scmp.lt.s32.totalorder %s2322_s5, %s2382_s2 }
  0xf6   : > { %p1324_p11 = scmp.lt.s32.totalorder %s1322_s27, %s1318_s29 }
  0xf7   : > { %p1320_p7 = pnand %p1319_p3, %p1492_p9 }
  0xf8   : > { %p1325_p8 = por %p1324_p11, %p1323_p10 }
  0xf9   : > { %p1321_p1 = pneg %p1320_p7 }
  0xfb   : > { %p1326_p0 = pnand %p1325_p8, %p1321_p1 }
  0xfd   : > { %1329 = shalt.err (!%p1326_p0)
}
  0xfe   : > { %1166 = dma.vmem_to_hbm [thread:$0]  (%p1492_p9), %s2324_s22, 1024, %s2322_s5, %s1011_s4  }
  0xff PF: > { %p1180_p2 = scmp.ge.s32.totalorder %s1404_s16, 2  ;;  %s1039_s20 = sand.u32 1, %s1376_s9  }
 0x100   : > { %s1040_s24 = scalar_lea.sflag [#allocation4], %s1039_s20 }
 0x101   : > { %p1176_p13 = pnand %p1180_p2, %p1498_p12 }
 0x103   : > { %p1177_p4 = pneg %p1176_p13 }
 0x105   : > { %1371 = dma.done.wait (%p1177_p4), %s1040_s24, 1024  }
 0x106   : > { %1373 = vsyncadd (%p1177_p4), %s1040_s24, 4294966272  ;;  %s21_s16 = sadd.s32 1, %s1404_s16   ;;  %s2523_s13 = sld [smem:[#allocation11_spill]] }
 0x107   : > { %p18_p5 = scmp.ge.s32.totalorder %s21_s16, 10   ;;  %s2524_s25 = sld [smem:[#allocation12_spill]] }
 0x108   : > { %s2525_s15 = sld [smem:[#allocation13_spill]]  ;;  %s2526_s9 = smov %s1380_s10 }
 0x109   : > { %s2527_s10 = smov %s1384_s11  ;;  %s2528_s11 = smov %s1507_s30 }
 0x10a   : > { %s2529_s12 = smov %s1396_s14  ;;  %20 = sbr.rel (!%p18_p5) target bundleno = 11 (0xb), region = 86 }
 0x10d   : > { %s2530_s14 = smov %s2524_s25 }
 0x10f   :  { %1045 = vsyncpa [#allocation3], 1 }
 0x110   :  { %1047 = vsyncpa [#allocation3 + $0x1], 1 }
 0x111   :  { %1048 = vsyncpa [#allocation6], 1 }
 0x112   :  { %1050 = vsyncpa [#allocation6 + $0x1], 1 }
 0x113   :  { %1051 = vsyncpa [#allocation4], 1 }
 0x114   :  { %1053 = vsyncpa [#allocation4 + $0x1], 1 }

</bundles_post_ra>
